<compile_context>
chip_gen: v7x
topology: tpu7x:2x2x1
jax: 0.10.0
libtpu: 0.0.40
codegen_flags: <defaults>
</compile_context>

<pallas_src>
import functools
import math

import jax
import jax.numpy as jnp
from jax.experimental import pallas as pl
from jax.experimental.pallas import tpu as pltpu


def _nbytes(shape, dtype):
    return math.prod(shape) * jnp.dtype(dtype).itemsize


def _round_up(x, m):
    return ((x + m - 1) // m) * m


def _vmem_capacity_bytes(default=64 << 20):
    """Per-core VMEM capacity; conservative default if the query fails."""
    try:
        info = pltpu.get_tpu_info()
        cap = getattr(info, "vmem_capacity_bytes", None)
        if cap:
            return int(cap)
    except Exception:   # hardware query only; never masks kernel errors
        pass
    return default


def _critic_kernel(n_hidden, mxu_dtype, *refs):
    """refs = x, labels, (W_0, b_0), ..., (W_{n-1}, b_{n-1}),
              proj_table, pbias_row, out_row, [acc scratch if n_hidden > 0]."""
    x_ref = refs[0]
    lab_ref = refs[1]
    wb = refs[2:2 + 2 * n_hidden]
    proj_ref = refs[2 + 2 * n_hidden]
    pbias_ref = refs[3 + 2 * n_hidden]
    out_ref = refs[4 + 2 * n_hidden]
    acc_ref = refs[5 + 2 * n_hidden] if n_hidden > 0 else None

    k = pl.program_id(1)
    nk = pl.num_programs(1)

    def head_and_store(y_f32):
        # Projection head on the last hidden activations (f32).
        bt = y_f32.shape[0]
        ncls = proj_ref.shape[0]
        lab = lab_ref[...]                                           # (bt, 1) i32
        onehot = (lab == jax.lax.broadcasted_iota(jnp.int32, (bt, ncls), 1)
                  ).astype(jnp.float32)                              # (bt, C)
        # Embedding gather as a one-hot MXU matmul against the resident table
        # (exact: each row selects exactly one table row).
        proj = jnp.dot(onehot, proj_ref[...],
                       preferred_element_type=jnp.float32)           # (bt, H)
        py = proj * y_f32                                            # (bt, H) f32
        # Row-sum over features produced directly in lane-dense (1, bt) layout.
        ones_row = jnp.ones((1, py.shape[1]), dtype=jnp.float32)
        s_row = jax.lax.dot_general(                                 # (1, bt)
            ones_row, py, dimension_numbers=(((1,), (1,)), ((), ())),
            preferred_element_type=jnp.float32)
        pb_row = jax.lax.dot_general(                                # (1, bt)
            pbias_ref[...], onehot, dimension_numbers=(((1,), (1,)), ((), ())),
            preferred_element_type=jnp.float32)
        out_ref[...] = s_row + pb_row

    if n_hidden == 0:
        # No hidden layers: projection acts directly on the data tile.
        head_and_store(x_ref[...].astype(jnp.float32))
        return

    # --- layer 0: K-tiled over the x_input axis (grid axis 1, "arbitrary"). ---
    @pl.when(k == 0)
    def _():
        acc_ref[...] = jnp.zeros_like(acc_ref)

    x = x_ref[...].astype(mxu_dtype)              # in-kernel f32 -> bf16 cast
    acc_ref[...] += jnp.dot(x, wb[0][...], preferred_element_type=jnp.float32)

    @pl.when(k == nk - 1)
    def _():
        y = jnp.maximum(acc_ref[...] + wb[1][...], 0.0)    # bias + ReLU, f32
        for i in range(1, n_hidden):
            w = wb[2 * i][...]
            b = wb[2 * i + 1][...]
            z = jnp.dot(y.astype(w.dtype), w, preferred_element_type=jnp.float32)
            y = jnp.maximum(z + b, 0.0)
        head_and_store(y)


def conditional_critic_proj(data, labels, weights, biases, proj_table, pbias_table,
                            *, batch_tile=512, k_tile=512, use_bf16=True):
    """Pallas implementation of ConditionalCriticProj.forward.

    data:   (B, x_input) float32
    labels: (B,) int32 in [0, num_classes)
    weights[i]: (in_i, out_i) float32  (transposed vs. torch Linear.weight)
    biases[i]:  (1, out_i) float32
    proj_table:  (num_classes, H_last) float32   (Embedding weight)
    pbias_table: (num_classes, 1) float32        (Embedding weight, zero-init)
    returns: (B, 1) float32
    """
    B, F = data.shape
    n_hidden = len(weights)
    num_classes = proj_table.shape[0]
    h_last = weights[-1].shape[1] if n_hidden else F
    h1 = weights[0].shape[1] if n_hidden else F
    mxu_dtype = jnp.bfloat16 if (use_bf16 and n_hidden > 0) else jnp.float32

    # ---- batch tiling: adaptive to B, multiple of 128 (lane-dense output). ----
    bt = max(128, min(batch_tile, _round_up(B, 128)))
    bt = (bt // 128) * 128
    b_pad = _round_up(B, bt)
    # Prefer >=2 steps on the parallel axis (v7x has 2 TensorCores).
    if b_pad // bt == 1 and bt >= 256 and (bt // 2) % 128 == 0:
        bt //= 2
        b_pad = _round_up(B, bt)

    # ---- K-tile the first Linear layer for large gene-expression dims. ----
    if n_hidden > 0 and F > 2048:
        tk = max(128, (min(k_tile, 2048) // 128) * 128)
        f_pad = _round_up(F, tk)
        # TODO(synk): for F not a multiple of tk this pads `data` (one extra HBM
        # copy); a ragged last K tile via pl.BoundedSlice would avoid it.
    else:
        tk = F
        f_pad = F
    n_k = max(1, f_pad // tk)

    # ---- generation-aware VMEM budget. ----
    cap = _vmem_capacity_bytes()
    budget = max(32 << 20, min(int(0.85 * cap), cap - (8 << 20)))

    def _estimate(bt_):
        widths = [w.shape[1] for w in weights] + [num_classes]
        if n_hidden == 0:
            widths.append(f_pad)
        max_w = max(widths)
        stream = (_nbytes((bt_, tk), jnp.float32)           # x tile (f32 in HBM)
                  + _nbytes((bt_, 1), jnp.int32)            # labels tile
                  + _nbytes((1, bt_), jnp.float32))         # output row tile
        resident = (_nbytes(proj_table.shape, jnp.float32)
                    + _nbytes((1, num_classes), jnp.float32))
        if n_hidden:
            stream += _nbytes((tk, h1), mxu_dtype)          # streamed W0 K-tile
            resident += _nbytes((1, h1), jnp.float32)       # b0
            resident += sum(_nbytes(w.shape, mxu_dtype) + _nbytes(b.shape, jnp.float32)
                            for w, b in zip(weights[1:], biases[1:]))
        acc = _nbytes((bt_, h1), jnp.float32) if n_hidden else 0
        temps = 6 * bt_ * max_w * 4                         # live f32 activation slabs
        return 2 * (stream + resident) + acc + temps        # 2x: double buffering

    while _estimate(bt) > budget and bt > 128:
        bt = max(128, ((bt // 2) // 128) * 128)
        b_pad = _round_up(B, bt)
    # TODO(synk): if still over budget at bt=128 (very wide hidden layers), also
    # K-tile the remaining Linear layers.

    # ---- wrapper-side padding / layout (single pad; no dtype pass over data). ----
    pad_rows, pad_cols = b_pad - B, f_pad - F
    if pad_rows or pad_cols:
        data = jnp.pad(data, ((0, pad_rows), (0, pad_cols)))
    if pad_rows:
        labels = jnp.pad(labels, (0, pad_rows))
    labels2d = labels.reshape(b_pad, 1).astype(jnp.int32)
    x = data.astype(jnp.float32)                       # stays f32; cast in-kernel

    weights_c = [w.astype(mxu_dtype) for w in weights]
    if n_hidden and pad_cols:
        weights_c[0] = jnp.pad(weights_c[0], ((0, pad_cols), (0, 0)))
    biases_c = [b.astype(jnp.float32) for b in biases]
    proj_tbl = proj_table.astype(jnp.float32)
    pbias_row = pbias_table.reshape(1, num_classes).astype(jnp.float32)

    # ---- grid / specs. ----
    grid = (b_pad // bt, n_k)
    in_specs = [pl.BlockSpec((bt, tk), lambda i, k: (i, k)),       # x: stream (i, k)
                pl.BlockSpec((bt, 1), lambda i, k: (i, 0))]        # labels: per-batch
    args = [x, labels2d]
    if n_hidden:
        in_specs += [pl.BlockSpec((tk, h1), lambda i, k: (k, 0)),  # W0: K-streamed
                     pl.BlockSpec((1, h1), lambda i, k: (0, 0))]   # b0: resident
        args += [weights_c[0], biases_c[0]]
        for w, b in zip(weights_c[1:], biases_c[1:]):
            in_specs += [pl.BlockSpec(w.shape, lambda i, k: (0, 0)),
                         pl.BlockSpec(b.shape, lambda i, k: (0, 0))]
            args += [w, b]
    in_specs += [pl.BlockSpec(proj_tbl.shape, lambda i, k: (0, 0)),       # resident
                 pl.BlockSpec((1, num_classes), lambda i, k: (0, 0))]     # resident
    args += [proj_tbl, pbias_row]
    out_spec = pl.BlockSpec((1, bt), lambda i, k: (0, i))          # lane-dense row
    scratch = [pltpu.VMEM((bt, h1), jnp.float32)] if n_hidden else []
    # TODO(synk): on v5e (lowest HBM BW), consider pipeline_mode=pl.Buffered(3)
    # on the x stream if xprof shows exposed DMA.

    # ---- cost estimate (advisory). ----
    flops = 2 * b_pad * num_classes * h_last + b_pad * (3 * h_last + 2 * num_classes)
    if n_hidden:
        flops += 2 * b_pad * f_pad * h1
        flops += sum(2 * b_pad * w.shape[0] * w.shape[1] for w in weights[1:])
        flops += b_pad * sum(2 * w.shape[1] for w in weights)
    bytes_accessed = (_nbytes((b_pad, f_pad), jnp.float32)
                      + _nbytes((b_pad, 1), jnp.int32)
                      + sum(_nbytes(w.shape, mxu_dtype) for w in weights_c)
                      + sum(_nbytes(b.shape, jnp.float32) for b in biases_c)
                      + _nbytes(proj_tbl.shape, jnp.float32)
                      + _nbytes((1, num_classes), jnp.float32)
                      + _nbytes((1, b_pad), jnp.float32))
    cost = pl.CostEstimate(flops=int(flops), transcendentals=0,
                           bytes_accessed=int(bytes_accessed))

    kernel = functools.partial(_critic_kernel, n_hidden, mxu_dtype)
    out_row = pl.pallas_call(
        kernel,
        out_shape=jax.ShapeDtypeStruct((1, b_pad), jnp.float32),
        grid=grid,
        in_specs=in_specs,
        out_specs=out_spec,
        scratch_shapes=scratch,
        compiler_params=pltpu.CompilerParams(
            dimension_semantics=("parallel", "arbitrary"),
            vmem_limit_bytes=int(budget)),
        cost_estimate=cost,
    )(*args)

    return out_row[0, :B][:, None]        # (B, 1)


def init_params(key, x_input, critic_layers, num_classes):
    """Deterministic init matching the PyTorch module's __init__ semantics."""
    weights, biases = [], []
    in_dim = x_input
    for out_dim in critic_layers:
        key, wk = jax.random.split(key)
        # kaiming_normal_(mode='fan_in', nonlinearity='relu'): std = sqrt(2 / fan_in)
        std = (2.0 / in_dim) ** 0.5
        w = std * jax.random.normal(wk, (in_dim, out_dim), dtype=jnp.float32)
        b = jnp.zeros((1, out_dim), dtype=jnp.float32)
        weights.append(w)
        biases.append(b)
        in_dim = out_dim
    # proj_bias = Embedding(num_classes, 1), zero-initialized.
    pbias_table = jnp.zeros((num_classes, 1), dtype=jnp.float32)
    # proj_layer = Embedding(num_classes, in_dim), xavier_uniform.
    key, pk = jax.random.split(key)
    bound = (6.0 / (num_classes + in_dim)) ** 0.5
    proj_table = jax.random.uniform(
        pk, (num_classes, in_dim), dtype=jnp.float32, minval=-bound, maxval=bound)
    return weights, biases, proj_table, pbias_table


def _reference(data, labels, weights, biases, proj_table, pbias_table,
               matmul_dtype=jnp.float32):
    y = data
    for w, b in zip(weights, biases):
        y = jnp.dot(y.astype(matmul_dtype), w.astype(matmul_dtype),
                    preferred_element_type=jnp.float32) + b
        y = jnp.maximum(y, 0.0)
    proj = proj_table[labels]
    return pbias_table[labels] + jnp.sum(proj * y, axis=1, keepdims=True)


if __name__ == "__main__":
    # Small, module-consistent shapes.
    B = 8              # batch (cells)
    x_input = 16       # gene-expression dimension
    critic_layers = [32, 32]
    num_classes = 4

    key = jax.random.PRNGKey(0)
    key, dk, lk, pk = jax.random.split(key, 4)
    data = jax.random.normal(dk, (B, x_input), dtype=jnp.float32)
    labels = jax.random.randint(lk, (B,), 0, num_classes, dtype=jnp.int32)

    weights, biases, proj_table, pbias_table = init_params(
        pk, x_input, critic_layers, num_classes)

    out = conditional_critic_proj(data, labels, weights, biases,
                                  proj_table, pbias_table)
    out = jax.block_until_ready(out)
    assert out.shape == (B, 1)

    # Tight check vs. a reference using the same bf16 MXU matmuls.
    ref_bf16 = _reference(data, labels, weights, biases, proj_table, pbias_table,
                          matmul_dtype=jnp.bfloat16)
    assert jnp.allclose(out, ref_bf16, atol=1e-3, rtol=1e-3), (out, ref_bf16)
    # Loose sanity check vs. the full-f32 reference (bf16 precision slack).
    ref_f32 = _reference(data, labels, weights, biases, proj_table, pbias_table)
    assert jnp.allclose(out, ref_f32, atol=1e-1, rtol=1e-1), (out, ref_f32)

    print("KERNEL_OK")
</pallas_src>

<mosaic_0001>
module attributes {stable_mosaic.version = 11 : i64} {
  func.func @_critic_kernel(%arg0: i32, %arg1: i32, %arg2: memref<128x16xf32, #tpu.memory_space<vmem>>, %arg3: memref<128x1xi32, #tpu.memory_space<vmem>>, %arg4: memref<16x32xbf16, #tpu.memory_space<vmem>>, %arg5: memref<1x32xf32, #tpu.memory_space<vmem>>, %arg6: memref<32x32xbf16, #tpu.memory_space<vmem>>, %arg7: memref<1x32xf32, #tpu.memory_space<vmem>>, %arg8: memref<4x32xf32, #tpu.memory_space<vmem>>, %arg9: memref<1x4xf32, #tpu.memory_space<vmem>>, %arg10: memref<1x128xf32, #tpu.memory_space<vmem>>, %arg11: memref<128x32xf32, #tpu.memory_space<vmem>>) attributes {dimension_semantics = [#tpu.dimension_semantics<parallel>, #tpu.dimension_semantics<arbitrary>], iteration_bounds = array<i64: 1, 1>, scalar_prefetch = 0 : i64, scratch_operands = 1 : i64, tpu.core_type = #tpu.core_type<tc>, window_params = [{transform_indices = @transform_0, window_bounds = array<i64: 128, 16>}, {transform_indices = @transform_1, window_bounds = array<i64: 128, 1>}, {transform_indices = @transform_2, window_bounds = array<i64: 16, 32>}, {pipeline_mode = #tpu.pipeline_mode<synchronous>, transform_indices = @transform_3, window_bounds = array<i64: 1, 32>}, {pipeline_mode = #tpu.pipeline_mode<synchronous>, transform_indices = @transform_4, window_bounds = array<i64: 32, 32>}, {pipeline_mode = #tpu.pipeline_mode<synchronous>, transform_indices = @transform_5, window_bounds = array<i64: 1, 32>}, {pipeline_mode = #tpu.pipeline_mode<synchronous>, transform_indices = @transform_6, window_bounds = array<i64: 4, 32>}, {pipeline_mode = #tpu.pipeline_mode<synchronous>, transform_indices = @transform_7, window_bounds = array<i64: 1, 4>}, {transform_indices = @transform_8, window_bounds = array<i64: 1, 128>}]} {
    %c0_i32 = arith.constant 0 : i32
    %0 = arith.cmpi eq, %arg1, %c0_i32 : i32
    %1 = arith.extui %0 : i1 to i32
    %c0_i32_0 = arith.constant 0 : i32
    %2 = arith.cmpi ne, %1, %c0_i32_0 : i32
    scf.if %2 {
      %cst_10 = arith.constant 0.000000e+00 : f32
      %13 = vector.broadcast %cst_10 : f32 to vector<128x32xf32>
      %c0_11 = arith.constant 0 : index
      %c0_12 = arith.constant 0 : index
      %14 = vector.load %arg11[%c0_11, %c0_12] : memref<128x32xf32, #tpu.memory_space<vmem>>, vector<128x32xf32>
      tpu.vector_store %arg11[%c0_11, %c0_12], %13 {strides = array<i32>} : memref<128x32xf32, #tpu.memory_space<vmem>>, vector<128x32xf32>,
    } else {
    }
    %c0 = arith.constant 0 : index
    %c0_1 = arith.constant 0 : index
    %3 = vector.load %arg2[%c0, %c0_1] : memref<128x16xf32, #tpu.memory_space<vmem>>, vector<128x16xf32>
    %4 = arith.truncf %3 : vector<128x16xf32> to vector<128x16xbf16>
    %c0_2 = arith.constant 0 : index
    %c0_3 = arith.constant 0 : index
    %5 = vector.load %arg11[%c0_2, %c0_3] : memref<128x32xf32, #tpu.memory_space<vmem>>, vector<128x32xf32>
    %c0_4 = arith.constant 0 : index
    %c0_5 = arith.constant 0 : index
    %6 = vector.load %arg4[%c0_4, %c0_5] : memref<16x32xbf16, #tpu.memory_space<vmem>>, vector<16x32xbf16>
    %cst = arith.constant dense<0.000000e+00> : vector<128x32xf32>
    %7 = tpu.matmul %4, %6, %cst {dimension_numbers = #tpu.dot_dimension_numbers<[1], [0], [0], [1], [0, 0, 1, 1], [], []>} : vector<128x16xbf16>, vector<16x32xbf16>, vector<128x32xf32> -> vector<128x32xf32>
    %8 = arith.addf %5, %7 : vector<128x32xf32>
    %c0_6 = arith.constant 0 : index
    %c0_7 = arith.constant 0 : index
    %9 = vector.load %arg11[%c0_6, %c0_7] : memref<128x32xf32, #tpu.memory_space<vmem>>, vector<128x32xf32>
    tpu.vector_store %arg11[%c0_6, %c0_7], %8 {strides = array<i32>} : memref<128x32xf32, #tpu.memory_space<vmem>>, vector<128x32xf32>,
    %c0_i32_8 = arith.constant 0 : i32
    %10 = arith.cmpi eq, %arg1, %c0_i32_8 : i32
    %11 = arith.extui %10 : i1 to i32
    %c0_i32_9 = arith.constant 0 : i32
    %12 = arith.cmpi ne, %11, %c0_i32_9 : i32
    scf.if %12 {
      %c0_10 = arith.constant 0 : index
      %c0_11 = arith.constant 0 : index
      %13 = vector.load %arg11[%c0_10, %c0_11] : memref<128x32xf32, #tpu.memory_space<vmem>>, vector<128x32xf32>
      %c0_12 = arith.constant 0 : index
      %c0_13 = arith.constant 0 : index
      %14 = vector.load %arg5[%c0_12, %c0_13] : memref<1x32xf32, #tpu.memory_space<vmem>>, vector<1x32xf32>
      %15 = vector.broadcast %14 : vector<1x32xf32> to vector<128x32xf32>
      %16 = arith.addf %13, %15 : vector<128x32xf32>
      %cst_14 = arith.constant 0.000000e+00 : f32
      %17 = vector.broadcast %cst_14 : f32 to vector<128x32xf32>
      %18 = arith.maximumf %16, %17 : vector<128x32xf32>
      %c0_15 = arith.constant 0 : index
      %c0_16 = arith.constant 0 : index
      %19 = vector.load %arg6[%c0_15, %c0_16] : memref<32x32xbf16, #tpu.memory_space<vmem>>, vector<32x32xbf16>
      %c0_17 = arith.constant 0 : index
      %c0_18 = arith.constant 0 : index
      %20 = vector.load %arg7[%c0_17, %c0_18] : memref<1x32xf32, #tpu.memory_space<vmem>>, vector<1x32xf32>
      %21 = arith.truncf %18 : vector<128x32xf32> to vector<128x32xbf16>
      %cst_19 = arith.constant dense<0.000000e+00> : vector<128x32xf32>
      %22 = tpu.matmul %21, %19, %cst_19 {dimension_numbers = #tpu.dot_dimension_numbers<[1], [0], [0], [1], [0, 0, 1, 1], [], []>} : vector<128x32xbf16>, vector<32x32xbf16>, vector<128x32xf32> -> vector<128x32xf32>
      %23 = vector.broadcast %20 : vector<1x32xf32> to vector<128x32xf32>
      %24 = arith.addf %22, %23 : vector<128x32xf32>
      %cst_20 = arith.constant 0.000000e+00 : f32
      %25 = vector.broadcast %cst_20 : f32 to vector<128x32xf32>
      %26 = arith.maximumf %24, %25 : vector<128x32xf32>
      %c0_21 = arith.constant 0 : index
      %c0_22 = arith.constant 0 : index
      %27 = vector.load %arg3[%c0_21, %c0_22] : memref<128x1xi32, #tpu.memory_space<vmem>>, vector<128x1xi32>
      %28 = tpu.iota {dimensions = array<i32: 1>} : vector<128x4xi32>
      %29 = vector.broadcast %27 : vector<128x1xi32> to vector<128x4xi32>
      %30 = arith.cmpi eq, %29, %28 : vector<128x4xi32>
      %31 = arith.extui %30 : vector<128x4xi1> to vector<128x4xi32>
      %32 = arith.sitofp %31 : vector<128x4xi32> to vector<128x4xf32>
      %c0_23 = arith.constant 0 : index
      %c0_24 = arith.constant 0 : index
      %33 = vector.load %arg8[%c0_23, %c0_24] : memref<4x32xf32, #tpu.memory_space<vmem>>, vector<4x32xf32>
      %cst_25 = arith.constant dense<0.000000e+00> : vector<128x32xf32>
      %34 = tpu.matmul %32, %33, %cst_25 {dimension_numbers = #tpu.dot_dimension_numbers<[1], [0], [0], [1], [0, 0, 1, 1], [], []>} : vector<128x4xf32>, vector<4x32xf32>, vector<128x32xf32> -> vector<128x32xf32>
      %35 = arith.mulf %34, %26 : vector<128x32xf32>
      %cst_26 = arith.constant 1.000000e+00 : f32
      %36 = vector.broadcast %cst_26 : f32 to vector<1x32xf32>
      %cst_27 = arith.constant dense<0.000000e+00> : vector<1x128xf32>
      %37 = tpu.matmul %36, %35, %cst_27 {dimension_numbers = #tpu.dot_dimension_numbers<[1], [1], [0], [0], [0, 0, 1, 0], [], []>} : vector<1x32xf32>, vector<128x32xf32>, vector<1x128xf32> -> vector<1x128xf32>
      %c0_28 = arith.constant 0 : index
      %c0_29 = arith.constant 0 : index
      %38 = vector.load %arg9[%c0_28, %c0_29] : memref<1x4xf32, #tpu.memory_space<vmem>>, vector<1x4xf32>
      %cst_30 = arith.constant dense<0.000000e+00> : vector<1x128xf32>
      %39 = tpu.matmul %38, %32, %cst_30 {dimension_numbers = #tpu.dot_dimension_numbers<[1], [1], [0], [0], [0, 0, 1, 0], [], []>} : vector<1x4xf32>, vector<128x4xf32>, vector<1x128xf32> -> vector<1x128xf32>
      %40 = arith.addf %37, %39 : vector<1x128xf32>
      %c0_31 = arith.constant 0 : index
      %c0_32 = arith.constant 0 : index
      %41 = vector.load %arg10[%c0_31, %c0_32] : memref<1x128xf32, #tpu.memory_space<vmem>>, vector<1x128xf32>
      tpu.vector_store %arg10[%c0_31, %c0_32], %40 {strides = array<i32>} : memref<1x128xf32, #tpu.memory_space<vmem>>, vector<1x128xf32>,
    } else {
    }
    return
  }
  func.func @transform_0(%arg0: i32, %arg1: i32) -> (i32, i32) {
    %c0_i32 = arith.constant 0 : i32
    return %arg0, %arg1 : i32, i32
  }
  func.func @transform_1(%arg0: i32, %arg1: i32) -> (i32, i32) {
    %c0_i32 = arith.constant 0 : i32
    %c0_i32_0 = arith.constant 0 : i32
    return %arg0, %c0_i32 : i32, i32
  }
  func.func @transform_2(%arg0: i32, %arg1: i32) -> (i32, i32) {
    %c0_i32 = arith.constant 0 : i32
    %c0_i32_0 = arith.constant 0 : i32
    return %arg1, %c0_i32 : i32, i32
  }
  func.func @transform_3(%arg0: i32, %arg1: i32) -> (i32, i32) {
    %c0_i32 = arith.constant 0 : i32
    %c0_i32_0 = arith.constant 0 : i32
    %c0_i32_1 = arith.constant 0 : i32
    return %c0_i32, %c0_i32_0 : i32, i32
  }
  func.func @transform_4(%arg0: i32, %arg1: i32) -> (i32, i32) {
    %c0_i32 = arith.constant 0 : i32
    %c0_i32_0 = arith.constant 0 : i32
    %c0_i32_1 = arith.constant 0 : i32
    return %c0_i32, %c0_i32_0 : i32, i32
  }
  func.func @transform_5(%arg0: i32, %arg1: i32) -> (i32, i32) {
    %c0_i32 = arith.constant 0 : i32
    %c0_i32_0 = arith.constant 0 : i32
    %c0_i32_1 = arith.constant 0 : i32
    return %c0_i32, %c0_i32_0 : i32, i32
  }
  func.func @transform_6(%arg0: i32, %arg1: i32) -> (i32, i32) {
    %c0_i32 = arith.constant 0 : i32
    %c0_i32_0 = arith.constant 0 : i32
    %c0_i32_1 = arith.constant 0 : i32
    return %c0_i32, %c0_i32_0 : i32, i32
  }
  func.func @transform_7(%arg0: i32, %arg1: i32) -> (i32, i32) {
    %c0_i32 = arith.constant 0 : i32
    %c0_i32_0 = arith.constant 0 : i32
    %c0_i32_1 = arith.constant 0 : i32
    return %c0_i32, %c0_i32_0 : i32, i32
  }
  func.func @transform_8(%arg0: i32, %arg1: i32) -> (i32, i32) {
    %c0_i32 = arith.constant 0 : i32
    %c0_i32_0 = arith.constant 0 : i32
    return %c0_i32, %arg0 : i32, i32
  }
}

</mosaic_0001>

<bundles_post_ra>
// kernel: tpu_custom_call.1
= control target key start
LH: loop header
LB: loop body
LE: loop exit
PB: predicated region body
PF: predicated region fallthrough
CT: control target
= control target key end

     0   :  { %vm100_vm0 = vcmask 130048   ;;  %v1414_v14 = vmov 0   ;;  %vm645_vm1 = vcmask 1043456   ;;  %s1829_s0 = inlined_call_operand.vmem [shape: f32[128,16], index: 0, kind: input, shape index: {}]   ;;  %s1830_s1 = inlined_call_operand.vmem [shape: s32[128,1], index: 1, kind: input, shape index: {}]   ;;  %s1831_s2 = inlined_call_operand.vmem [shape: bf16[16,32], index: 2, kind: input, shape index: {}]   ;;  %s1832_s3 = inlined_call_operand.vmem [shape: f32[1,32], index: 3, kind: input, shape index: {}]   ;;  %s1833_s4 = inlined_call_operand.vmem [shape: bf16[32,32], index: 4, kind: input, shape index: {}]   ;;  %s1834_s5 = inlined_call_operand.vmem [shape: f32[1,32], index: 5, kind: input, shape index: {}]   ;;  %s1835_s6 = inlined_call_operand.vmem [shape: f32[4,32], index: 6, kind: input, shape index: {}]   ;;  %s1836_s7 = inlined_call_operand.vmem [shape: f32[1,4], index: 7, kind: input, shape index: {}]   ;;  %s1837_s8 = inlined_call_operand.hbm [shape: f32[1,128], index: 8, kind: output, shape index: {}]  }
   0x1   :  { %v1387_v0 = vld [vmem:[%s1831_s2] sm:$0xff]   ;;  %v53_v2 = vld [vmem:[%s1829_s0 + $0x8] sm:$0xff]  ;;  %v54_v3 = vld [vmem:[%s1829_s0 + $0x10] sm:$0xff]  ;;  %1385 = vset.pattern.permute.xlu0 %v1414_v14  ;;  %1386 = vset.pattern.permute.xlu1 %v1414_v14 }
   0x2   :  { %v52_v1 = vld [vmem:[%s1829_s0] sm:$0xff]  ;;  %1178 = vmatprep.subr.bf16.mxu0 %v1387_v0  ;;  %v55_v5 = vld [vmem:[%s1829_s0 + $0x18] sm:$0xff]  ;;  %v57_v7 = vld [vmem:[%s1829_s0 + $0x28] sm:$0xff]  ;;  %1376 = vmatprep.subr.bf16.mxu1 %v1387_v0 }
   0x3   :  { %v68_v4 = vpack.c.bf16 %v53_v2, %v52_v1  ;;  %v56_v6 = vld [vmem:[%s1829_s0 + $0x20] sm:$0xff]  ;;  %1179 = vmatpush3.bf16.msra.mxu0 %v1387_v0  ;;  %v69_v8 = vpack.c.bf16 %v55_v5, %v54_v3  ;;  %1377 = vmatpush3.bf16.msra.mxu1 %v1387_v0  ;;  %v61_v11 = vld [vmem:[%s1829_s0 + $0x48] sm:$0xff]  ;;  %v62_v12 = vld [vmem:[%s1829_s0 + $0x50] sm:$0xff] }
   0x4   :  { %v70_v9 = vpack.c.bf16 %v57_v7, %v56_v6  ;;  %v60_v10 = vld [vmem:[%s1829_s0 + $0x40] sm:$0xff]  ;;  %v63_v13 = vld [vmem:[%s1829_s0 + $0x58] sm:$0xff]  ;;  %v65_v18 = vld [vmem:[%s1829_s0 + $0x68] sm:$0xff] }
   0x5   :  { %1180 = vmatprep.mubr.msk.bf16.mxu0 %vm100_vm0, %v68_v4  ;;  %v72_v15 = vpack.c.bf16 %v61_v11, %v60_v10  ;;  %v73_v16 = vpack.c.bf16 %v63_v13, %v62_v12  ;;  %v64_v17 = vld [vmem:[%s1829_s0 + $0x60] sm:$0xff]  ;;  %v58_v21 = vld [vmem:[%s1829_s0 + $0x30] sm:$0xff]  ;;  %v59_v22 = vld [vmem:[%s1829_s0 + $0x38] sm:$0xff] }
   0x6   :  { %1181 = vmatmul.mubr.msk.bf16.vlgmr.msra.gmra.mrb[0].mxu0 %vm100_vm0, %v69_v8  ;;  %v74_v19 = vpack.c.bf16 %v65_v18, %v64_v17  ;;  %v481_v20 = vld [vmem:[%s1830_s1] sm:$0xff]  ;;  %v483_v23 = vld [vmem:[%s1830_s1 + $0x10] sm:$0xff]  ;;  %v67_v25 = vld [vmem:[%s1829_s0 + $0x78] sm:$0xff]  ;;  %v71_v27 = vpack.c.bf16 %v59_v22, %v58_v21 }
   0x7   :  { %1184 = vmatprep.mubr.msk.bf16.mxu0 %vm100_vm0, %v70_v9  ;;  %1188 = vmatprep.mubr.msk.bf16.mxu1 %vm100_vm0, %v72_v15  ;;  %v66_v24 = vld [vmem:[%s1829_s0 + $0x70] sm:$0xff]  ;;  %v482_v26 = vld [vmem:[%s1830_s1 + $0x8] sm:$0xff]  ;;  %v484_v28 = vld [vmem:[%s1830_s1 + $0x18] sm:$0xff] }
   0x8   :  { %1189 = vmatmul.mubr.msk.bf16.vlgmr.msra.gmra.mrb[0].mxu1 %vm100_vm0, %v73_v16  ;;  %500 = vperm.xlu0 %1385, %v481_v20   ;;  %v595_v29 = vld [vmem:[%s1835_s6] sm:$0xf]  ;;  %v75_v30 = vpack.c.bf16 %v67_v25, %v66_v24 }
   0x9   :  { %1192 = vmatprep.mubr.msk.bf16.mxu1 %vm100_vm0, %v74_v19  ;;  %506 = vperm.xlu1 %1386, %v483_v23   ;;  %v485_v31 = vld [vmem:[%s1830_s1 + $0x20] sm:$0xff] }
   0xa   :  { %1216 = vmatprep.subr.msk.mxu0 %vm645_vm1, %v595_v29 }
   0xb   :  { %1217 = vmatpush3.msk.msra.mxu0 %vm645_vm1, %v595_v29 }
   0xc   :  { %503 = vperm.xlu0 %1385, %v482_v26  }
   0xd   :  { %509 = vperm.xlu1 %1386, %v484_v28  }
   0xe   :  { %13 = vsyncpa [#allocation4], 0  ;;  %1185 = vmatmul.mubr.msk.bf16.gmra.mrb[4].mxu0 %vm100_vm0, %v71_v27  ;;  %v486_v32 = vld [vmem:[%s1830_s1 + $0x28] sm:$0xff]  ;;  %v1415_v33 = vmov 0.0|0.0   ;;  %v487_v34 = vld [vmem:[%s1830_s1 + $0x30] sm:$0xff]  ;;  %vm35_vm2 = vcmask 261120   ;;  %v497_v47 = vlaneseq }
   0xf   :  { %1312 = vmatprep.subr.bf16.mxu0 %v1415_v33  ;;  %v488_v35 = vld [vmem:[%s1830_s1 + $0x38] sm:$0xff]  ;;  %v489_v36 = vld [vmem:[%s1830_s1 + $0x40] sm:$0xff]  ;;  %v490_v37 = vld [vmem:[%s1830_s1 + $0x48] sm:$0xff]  ;;  %v1416_v44 = vmov 0.0   ;;  %vm596_vm3 = vcmask 31744  }
  0x10   :  { %1193 = vmatmul.mubr.msk.bf16.gmra.mrb[4].mxu1 %vm100_vm0, %v75_v30  ;;  %512 = vperm.xlu0 %1385, %v485_v31   ;;  %v491_v38 = vld [vmem:[%s1830_s1 + $0x50] sm:$0xff]  ;;  %v492_v39 = vld [vmem:[%s1830_s1 + $0x58] sm:$0xff]  ;;  %v493_v40 = vld [vmem:[%s1830_s1 + $0x60] sm:$0xff]  ;;  %38 = vst.msk [vmem:[#allocation2 + $0x10] sm:$0xff] %vm35_vm2, %v1416_v44  ;;  %v1615_v48 = vand.u32 127, %v497_v47 }
  0x11   :  { %515 = vperm.xlu1 %1386, %v486_v32   ;;  %v494_v41 = vld [vmem:[%s1830_s1 + $0x68] sm:$0xff]  ;;  %v495_v42 = vld [vmem:[%s1830_s1 + $0x70] sm:$0xff]  ;;  %v496_v43 = vld [vmem:[%s1830_s1 + $0x78] sm:$0xff]  ;;  %36 = vst.msk [vmem:[#allocation2] sm:$0xff] %vm35_vm2, %v1416_v44 }
  0x12   :  { %37 = vst.msk [vmem:[#allocation2 + $0x8] sm:$0xff] %vm35_vm2, %v1416_v44  ;;  %39 = vst.msk [vmem:[#allocation2 + $0x18] sm:$0xff] %vm35_vm2, %v1416_v44  ;;  %v1388_v45 = vld [vmem:[%s1833_s4] sm:$0xff]   ;;  %v1389_v46 = vld [vmem:[%s1833_s4 + $0x8] sm:$0xff]  }
  0x13   :  { %40 = vst.msk [vmem:[#allocation2 + $0x20] sm:$0xff] %vm35_vm2, %v1416_v44  ;;  %41 = vst.msk [vmem:[#allocation2 + $0x28] sm:$0xff] %vm35_vm2, %v1416_v44  ;;  %1196 = vmatprep.subr.bf16.mxu1 %v1388_v45 }
  0x14   :  { %518 = vperm.xlu0 %1385, %v487_v34   ;;  %42 = vst.msk [vmem:[#allocation2 + $0x30] sm:$0xff] %vm35_vm2, %v1416_v44  ;;  %43 = vst.msk [vmem:[#allocation2 + $0x38] sm:$0xff] %vm35_vm2, %v1416_v44  ;;  %1197 = vmatpush3.bf16.msra.mxu1 %v1388_v45 }
  0x15   :  { %521 = vperm.xlu1 %1386, %v488_v35   ;;  %44 = vst.msk [vmem:[#allocation2 + $0x40] sm:$0xff] %vm35_vm2, %v1416_v44  ;;  %45 = vst.msk [vmem:[#allocation2 + $0x48] sm:$0xff] %vm35_vm2, %v1416_v44  ;;  %1198 = vmatprep.subr.bf16.mxu1 %v1389_v46 }
  0x16   :  { %46 = vst.msk [vmem:[#allocation2 + $0x50] sm:$0xff] %vm35_vm2, %v1416_v44  ;;  %47 = vst.msk [vmem:[#allocation2 + $0x58] sm:$0xff] %vm35_vm2, %v1416_v44 }
  0x17   :  { %48 = vst.msk [vmem:[#allocation2 + $0x60] sm:$0xff] %vm35_vm2, %v1416_v44  ;;  %49 = vst.msk [vmem:[#allocation2 + $0x68] sm:$0xff] %vm35_vm2, %v1416_v44  ;;  %v78_v26 = vld [vmem:[#allocation2 + $0x10] sm:$0xff] }
  0x18   :  { %524 = vperm.xlu0 %1385, %v489_v36   ;;  %50 = vst.msk [vmem:[#allocation2 + $0x70] sm:$0xff] %vm35_vm2, %v1416_v44  ;;  %51 = vst.msk [vmem:[#allocation2 + $0x78] sm:$0xff] %vm35_vm2, %v1416_v44  ;;  %1199 = vmatpush3.bf16.msra.mxu1 %v1389_v46  ;;  %v76_v27 = vld [vmem:[#allocation2] sm:$0xff] }
  0x19   :  { %527 = vperm.xlu1 %1386, %v490_v37   ;;  %1344 = vmatprep.subr.bf16.mxu1 %v1415_v33  ;;  %vm1625_vm7 = vmpackc.low %vm596_vm3, %vm596_vm3  ;;  %v79_v29 = vld [vmem:[#allocation2 + $0x18] sm:$0xff]  ;;  %v77_v34 = vld [vmem:[#allocation2 + $0x8] sm:$0xff] }
  0x1b   :  { %v83_v55 = vld [vmem:[#allocation2 + $0x38] sm:$0xff] }
  0x1c   :  { %530 = vperm.xlu0 %1385, %v491_v38   ;;  %v84_v35 = vld [vmem:[#allocation2 + $0x40] sm:$0xff]  ;;  %v85_v45 = vld [vmem:[#allocation2 + $0x48] sm:$0xff] }
  0x1d   :  { %533 = vperm.xlu1 %1386, %v492_v39   ;;  %v86_v30 = vld [vmem:[#allocation2 + $0x50] sm:$0xff]  ;;  %v87_v39 = vld [vmem:[#allocation2 + $0x58] sm:$0xff] }
  0x20   :  { %536 = vperm.xlu0 %1385, %v493_v40  }
  0x21   :  { %539 = vperm.xlu1 %1386, %v494_v41  }
  0x24   :  { %542 = vperm.xlu0 %1385, %v495_v42  }
  0x25   :  { %545 = vperm.xlu1 %1386, %v496_v43  }
  0x87   :  { %v501_v49 = vpop.permute.xlu0 %500 }
  0x88   :  { %vm547_vm4 = vcmp.eq.s32.totalorder %v501_v49, %v1615_v48  ;;  %v507_v50 = vpop.permute.xlu1 %506 }
  0x89   :  { %v1041_v51 = vsel %vm547_vm4, 1.0, %v1416_v44  ;;  %vm549_vm5 = vcmp.eq.s32.totalorder %v507_v50, %v1615_v48 }
  0x8a   :  { %1218 = vmatprep.mubr.msk.f32.mxu0 %vm596_vm3, %v1041_v51  ;;  %v1043_v57 = vsel %vm549_vm5, 1.0, %v1416_v44 }
  0x8b   :  { %v504_v52 = vpop.permute.xlu0 %503 }
  0x8c   :  { %vm548_vm6 = vcmp.eq.s32.totalorder %v504_v52, %v1615_v48  ;;  %v510_v53 = vpop.permute.xlu1 %509 }
  0x8d   :  { %v1042_v54 = vsel %vm548_vm6, 1.0, %v1416_v44  ;;  %vm550_vm8 = vcmp.eq.s32.totalorder %v510_v53, %v1615_v48  ;;  %v80_v53 = vld [vmem:[#allocation2 + $0x20] sm:$0xff] }
  0x8e   :  { %v1313_v56 = vpack.c.bf16 %v1042_v54, %v1041_v51  ;;  %1219 = vmatmul.mubr.msk.f32.vlgmr.msra.gmra.mrb[8].mxu0 %vm596_vm3, %v1042_v54  ;;  %v1044_v60 = vsel %vm550_vm8, 1.0, %v1416_v44  ;;  %v82_v51 = vld [vmem:[#allocation2 + $0x30] sm:$0xff] }
  0x8f   :  { %v513_v58 = vpop.permute.xlu0 %512  ;;  %1221 = vmatprep.mubr.msk.f32.mxu0 %vm596_vm3, %v1043_v57  ;;  %v1317_v63 = vpack.c.bf16 %v1044_v60, %v1043_v57 }
  0x90   :  { %1315 = vmatpush3.bf16.xpose.msk.msra.mxu0 %vm1625_vm7, %v1313_v56  ;;  %v516_v59 = vpop.permute.xlu1 %515  ;;  %vm551_vm9 = vcmp.eq.s32.totalorder %v513_v58, %v1615_v48  ;;  %v90_v56 = vld [vmem:[#allocation2 + $0x70] sm:$0xff] }
  0x91   :  { %1316 = vmatprep.subr.bf16.mxu0 %v1415_v33  ;;  %vm552_vm10 = vcmp.eq.s32.totalorder %v516_v59, %v1615_v48  ;;  %v1045_v61 = vsel %vm551_vm9, 1.0, %v1416_v44  ;;  %v81_v59 = vld [vmem:[#allocation2 + $0x28] sm:$0xff] }
  0x92   :  { %1222 = vmatmul.mubr.msk.f32.gmra.mrb[10].mxu0 %vm596_vm3, %v1044_v60  ;;  %v1046_v1 = vsel %vm552_vm10, 1.0, %v1416_v44  ;;  %v1705_v60 = vld [vmem:[%s1832_s3] ss:$0 sm:$0xff] }
  0x93   :  { %v519_v62 = vpop.permute.xlu0 %518  ;;  %1224 = vmatprep.mubr.msk.f32.mxu0 %vm596_vm3, %v1045_v61  ;;  %v1321_v8 = vpack.c.bf16 %v1046_v1, %v1045_v61  ;;  %v88_v61 = vld [vmem:[#allocation2 + $0x60] sm:$0xff] }
  0x94   :  { %v522_v0 = vpop.permute.xlu1 %521  ;;  %vm553_vm11 = vcmp.eq.s32.totalorder %v519_v62, %v1615_v48 }
  0x95   :  { %vm554_vm12 = vcmp.eq.s32.totalorder %v522_v0, %v1615_v48  ;;  %v1047_v2 = vsel %vm553_vm11, 1.0, %v1416_v44 }
  0x96   :  { %1225 = vmatmul.mubr.msk.f32.gmra.mrb[12].mxu0 %vm596_vm3, %v1046_v1  ;;  %v1048_v5 = vsel %vm554_vm12, 1.0, %v1416_v44 }
  0x97   :  { %v525_v3 = vpop.permute.xlu0 %524  ;;  %1227 = vmatprep.mubr.msk.f32.mxu0 %vm596_vm3, %v1047_v2  ;;  %v1325_v17 = vpack.c.bf16 %v1048_v5, %v1047_v2  ;;  %v91_v2 = vld [vmem:[#allocation2 + $0x78] sm:$0xff] }
  0x98   :  { %1319 = vmatpush3.bf16.xpose.msk.msra.mxu0 %vm1625_vm7, %v1317_v63  ;;  %v528_v4 = vpop.permute.xlu1 %527  ;;  %vm555_vm13 = vcmp.eq.s32.totalorder %v525_v3, %v1615_v48 }
  0x99   :  { %1320 = vmatprep.subr.bf16.mxu0 %v1415_v33  ;;  %vm556_vm14 = vcmp.eq.s32.totalorder %v528_v4, %v1615_v48  ;;  %v1049_v6 = vsel %vm555_vm13, 1.0, %v1416_v44 }
  0x9a   :  { %1228 = vmatmul.mubr.msk.f32.gmra.mrb[14].mxu0 %vm596_vm3, %v1048_v5  ;;  %v1050_v10 = vsel %vm556_vm14, 1.0, %v1416_v44 }
  0x9b   :  { %v531_v7 = vpop.permute.xlu0 %530  ;;  %1230 = vmatprep.mubr.msk.f32.mxu0 %vm596_vm3, %v1049_v6  ;;  %v1329_v22 = vpack.c.bf16 %v1050_v10, %v1049_v6 }
  0x9c   :  { %v534_v9 = vpop.permute.xlu1 %533  ;;  %vm557_vm15 = vcmp.eq.s32.totalorder %v531_v7, %v1615_v48 }
  0x9d   :  { %vm558_vm0 = vcmp.eq.s32.totalorder %v534_v9, %v1615_v48  ;;  %v1051_v11 = vsel %vm557_vm15, 1.0, %v1416_v44 }
  0x9e   :  { %1231 = vmatmul.mubr.msk.f32.gmra.mrb[16].mxu0 %vm596_vm3, %v1050_v10  ;;  %v1052_v14 = vsel %vm558_vm0, 1.0, %v1416_v44 }
  0x9f   :  { %v537_v12 = vpop.permute.xlu0 %536  ;;  %1233 = vmatprep.mubr.msk.f32.mxu0 %vm596_vm3, %v1051_v11  ;;  %v1333_v23 = vpack.c.bf16 %v1052_v14, %v1051_v11 }
  0xa0   :  { %1323 = vmatpush3.bf16.xpose.msk.msra.mxu0 %vm1625_vm7, %v1321_v8  ;;  %v540_v13 = vpop.permute.xlu1 %539  ;;  %vm559_vm1 = vcmp.eq.s32.totalorder %v537_v12, %v1615_v48  ;;  %v89_v8 = vld [vmem:[#allocation2 + $0x68] sm:$0xff] }
  0xa1   :  { %1324 = vmatprep.subr.bf16.mxu0 %v1415_v33  ;;  %vm560_vm4 = vcmp.eq.s32.totalorder %v540_v13, %v1615_v48  ;;  %v1053_v15 = vsel %vm559_vm1, 1.0, %v1416_v44 }
  0xa2   :  { %1234 = vmatmul.mubr.msk.f32.gmra.mrb[18].mxu0 %vm596_vm3, %v1052_v14  ;;  %v1054_v19 = vsel %vm560_vm4, 1.0, %v1416_v44 }
  0xa3   :  { %v543_v16 = vpop.permute.xlu0 %542  ;;  %1236 = vmatprep.mubr.msk.f32.mxu0 %vm596_vm3, %v1053_v15  ;;  %v1337_v24 = vpack.c.bf16 %v1054_v19, %v1053_v15 }
  0xa4   :  { %v546_v18 = vpop.permute.xlu1 %545  ;;  %vm561_vm5 = vcmp.eq.s32.totalorder %v543_v16, %v1615_v48 }
  0xa5   :  { %v1055_v20 = vsel %vm561_vm5, 1.0, %v1416_v44  ;;  %vm562_vm6 = vcmp.eq.s32.totalorder %v546_v18, %v1615_v48 }
  0xa6   :  { %1237 = vmatmul.mubr.msk.f32.gmra.mrb[20].mxu0 %vm596_vm3, %v1054_v19  ;;  %v1056_v21 = vsel %vm562_vm6, 1.0, %v1416_v44 }
  0xa7   :  { %1239 = vmatprep.mubr.msk.f32.mxu0 %vm596_vm3, %v1055_v20  ;;  %v1341_v25 = vpack.c.bf16 %v1056_v21, %v1055_v20 }
  0xa8   :  { %1327 = vmatpush3.bf16.xpose.msk.msra.mxu0 %vm1625_vm7, %v1325_v17 }
  0xa9   :  { %1328 = vmatprep.subr.bf16.mxu0 %v1415_v33 }
  0xaa   :  { %1240 = vmatmul.mubr.msk.f32.gmra.mrb[22].mxu0 %vm596_vm3, %v1056_v21 }
  0xb0   :  { %1331 = vmatpush3.bf16.xpose.msk.msra.mxu0 %vm1625_vm7, %v1329_v22 }
  0xb1   :  { %1332 = vmatprep.subr.bf16.mxu0 %v1415_v33 }
  0xb8   :  { %1335 = vmatpush3.bf16.xpose.msk.msra.mxu0 %vm1625_vm7, %v1333_v23 }
  0xb9   :  { %1336 = vmatprep.subr.bf16.mxu0 %v1415_v33 }
  0xc0   :  { %1339 = vmatpush3.bf16.xpose.msk.msra.mxu0 %vm1625_vm7, %v1337_v24 }
  0xc1   :  { %1340 = vmatprep.subr.bf16.mxu0 %v1415_v33 }
  0xc8   :  { %1343 = vmatpush3.bf16.xpose.msk.msra.mxu0 %vm1625_vm7, %v1341_v25  ;;  %vm1417_vm7 = vmmov 0  }
  0xc9   :  { %1274 = vmatprep.mubr.msk.f32.mxu0 %vm1417_vm7, %v1416_v44 }
  0xd9   :  { %v1182_v28 = vpop.f32.mrb[0].mxu0 }
  0xda   :  { %v224_v31 = vadd.f32 %v1182_v28, %v78_v26  ;;  %v159_v32 = vpop.f32.mrb[1].mxu0 }
  0xdb   :  { %v222_v36 = vadd.f32 %v159_v32, %v76_v27  ;;  %v1183_v37 = vpop.f32.mrb[2].mxu0  ;;  %v1190_v38 = vpop.f32.mrb[0].mxu1 }
  0xdc   :  { %241 = vst.msk [vmem:[#allocation2 + $0x10] sm:$0xff] %vm35_vm2, %v224_v31  ;;  %v225_v40 = vadd.f32 %v1183_v37, %v79_v29  ;;  %v162_v41 = vpop.f32.mrb[3].mxu0  ;;  %v232_v42 = vadd.f32 %v1190_v38, %v86_v30  ;;  %v191_v43 = vpop.f32.mrb[1].mxu1 }
  0xdd   :  { %239 = vst.msk [vmem:[#allocation2] sm:$0xff] %vm35_vm2, %v222_v36  ;;  %v223_v46 = vadd.f32 %v162_v41, %v77_v34  ;;  %v230_v47 = vadd.f32 %v191_v43, %v84_v35  ;;  %v1191_v48 = vpop.f32.mrb[2].mxu1 }
  0xde   :  { %242 = vst.msk [vmem:[#allocation2 + $0x18] sm:$0xff] %vm35_vm2, %v225_v40  ;;  %249 = vst.msk [vmem:[#allocation2 + $0x50] sm:$0xff] %vm35_vm2, %v232_v42  ;;  %v233_v49 = vadd.f32 %v1191_v48, %v87_v39  ;;  %v194_v50 = vpop.f32.mrb[3].mxu1 }
  0xdf   :  { %240 = vst.msk [vmem:[#allocation2 + $0x8] sm:$0xff] %vm35_vm2, %v223_v46  ;;  %247 = vst.msk [vmem:[#allocation2 + $0x40] sm:$0xff] %vm35_vm2, %v230_v47  ;;  %v231_v52 = vadd.f32 %v194_v50, %v85_v45 }
  0xe0   :  { %250 = vst.msk [vmem:[#allocation2 + $0x58] sm:$0xff] %vm35_vm2, %v233_v49 }
  0xe1   :  { %v1186_v54 = vpop.f32.mrb[4].mxu0  ;;  %248 = vst.msk [vmem:[#allocation2 + $0x48] sm:$0xff] %vm35_vm2, %v231_v52 }
  0xe2   :  { %v228_v57 = vadd.f32 %v1186_v54, %v82_v51  ;;  %v175_v58 = vpop.f32.mrb[5].mxu0 }
  0xe3   :  { %v226_v62 = vadd.f32 %v175_v58, %v80_v53  ;;  %v1187_v63 = vpop.f32.mrb[6].mxu0  ;;  %v260_v0 = vld [vmem:[#allocation2 + $0x10] sm:$0xff]  ;;  %v1194_v1 = vpop.f32.mrb[4].mxu1 }
  0xe4   :  { %245 = vst.msk [vmem:[#allocation2 + $0x30] sm:$0xff] %vm35_vm2, %v228_v57  ;;  %v229_v3 = vadd.f32 %v1187_v63, %v83_v55  ;;  %v178_v4 = vpop.f32.mrb[7].mxu0  ;;  %v258_v5 = vld [vmem:[#allocation2] sm:$0xff]  ;;  %v236_v6 = vadd.f32 %v1194_v1, %v90_v56  ;;  %v207_v7 = vpop.f32.mrb[5].mxu1  ;;  %v283_v15 = vadd.f32 %v1705_v60, %v260_v0 }
  0xe5   :  { %243 = vst.msk [vmem:[#allocation2 + $0x20] sm:$0xff] %vm35_vm2, %v226_v62  ;;  %v227_v9 = vadd.f32 %v178_v4, %v81_v59  ;;  %v281_v10 = vadd.f32 %v1705_v60, %v258_v5  ;;  %v261_v11 = vld [vmem:[#allocation2 + $0x18] sm:$0xff]  ;;  %v234_v12 = vadd.f32 %v207_v7, %v88_v61  ;;  %v1195_v13 = vpop.f32.mrb[6].mxu1  ;;  %v268_v45 = vld [vmem:[#allocation2 + $0x50] sm:$0xff] }
  0xe6   :  { %246 = vst.msk [vmem:[#allocation2 + $0x38] sm:$0xff] %vm35_vm2, %v229_v3  ;;  %v259_v14 = vld [vmem:[#allocation2 + $0x8] sm:$0xff]  ;;  %v284_v16 = vadd.f32 %v1705_v60, %v261_v11  ;;  %253 = vst.msk [vmem:[#allocation2 + $0x70] sm:$0xff] %vm35_vm2, %v236_v6  ;;  %v237_v17 = vadd.f32 %v1195_v13, %v91_v2  ;;  %v210_v18 = vpop.f32.mrb[7].mxu1  ;;  %v266_v22 = vld [vmem:[#allocation2 + $0x40] sm:$0xff]  ;;  %v299_v26 = vmax.f32 %v283_v15, 0.0  ;;  %v291_v52 = vadd.f32 %v1705_v60, %v268_v45 }
  0xe7   :  { %244 = vst.msk [vmem:[#allocation2 + $0x28] sm:$0xff] %vm35_vm2, %v227_v9  ;;  %v282_v19 = vadd.f32 %v1705_v60, %v259_v14  ;;  %251 = vst.msk [vmem:[#allocation2 + $0x60] sm:$0xff] %vm35_vm2, %v234_v12  ;;  %v235_v20 = vadd.f32 %v210_v18, %v89_v8  ;;  %v297_v24 = vmax.f32 %v281_v10, 0.0  ;;  %v289_v29 = vadd.f32 %v1705_v60, %v266_v22  ;;  %v269_v46 = vld [vmem:[#allocation2 + $0x58] sm:$0xff] }
  0xe8   :  { %v300_v21 = vmax.f32 %v284_v16, 0.0  ;;  %254 = vst.msk [vmem:[#allocation2 + $0x78] sm:$0xff] %vm35_vm2, %v237_v17  ;;  %v267_v23 = vld [vmem:[#allocation2 + $0x48] sm:$0xff]  ;;  %v292_v53 = vadd.f32 %v1705_v60, %v269_v46  ;;  %v307_v58 = vmax.f32 %v291_v52, 0.0 }
  0xe9   :  { %v298_v25 = vmax.f32 %v282_v19, 0.0  ;;  %252 = vst.msk [vmem:[#allocation2 + $0x68] sm:$0xff] %vm35_vm2, %v235_v20  ;;  %v290_v30 = vadd.f32 %v1705_v60, %v267_v23  ;;  %v305_v42 = vmax.f32 %v289_v29, 0.0  ;;  %v810_v23 = vld [vmem:[%s1836_s7] sm:$0x1] }
  0xea   :  { %v319_v31 = vpack.c.bf16 %v300_v21, %v299_v26  ;;  %v308_v59 = vmax.f32 %v292_v53, 0.0  ;;  %1275 = vmatmul.mubr.msk.f32.vlgmr.msra.gmra.mrb[24].mxu0 %vm596_vm3, %v810_v23  ;;  %vm1771_vm3 = vmpackc.low %vm35_vm2, %vm35_vm2 }
  0xeb   :  { %v318_v27 = vpack.c.bf16 %v298_v25, %v297_v24  ;;  %v264_v28 = vld [vmem:[#allocation2 + $0x30] sm:$0xff]  ;;  %v306_v43 = vmax.f32 %v290_v30, 0.0  ;;  %v1762_v24 = vld [vmem:[%s1834_s5] ss:$0 sm:$0xff]  ;;  %s1419_s5 = smov [#allocation3]  }
  0xec   :  { %v262_v32 = vld [vmem:[#allocation2 + $0x20] sm:$0xff]  ;;  %v287_v34 = vadd.f32 %v1705_v60, %v264_v28  ;;  %v323_v1 = vpack.c.bf16 %v308_v59, %v307_v58  ;;  %s1012_s7 = sshll.u32 %s1419_s5, 4  ;;  %s1013_s7 = int_to_ptr.vmem [resolvable:$true] %s1012_s7 }
  0xed   :  { %1200 = vmatprep.mubr.msk.bf16.mxu1 %vm35_vm2, %v318_v27  ;;  %v285_v35 = vadd.f32 %v1705_v60, %v262_v32  ;;  %v265_v36 = vld [vmem:[#allocation2 + $0x38] sm:$0xff]  ;;  %v322_v55 = vpack.c.bf16 %v306_v43, %v305_v42  ;;  %v272_v63 = vld [vmem:[#allocation2 + $0x70] sm:$0xff]  ;;  %s1390_s29 = scalar_lea.vmem %s1013_s7, 16  ;;  %s1394_s30 = scalar_lea.vmem %s1013_s7, 32 }
  0xee   :  { %1201 = vmatmul.mubr.msk.bf16.vlgmr.msra.gmra.mrb[8].mxu1 %vm35_vm2, %v319_v31  ;;  %v263_v37 = vld [vmem:[#allocation2 + $0x28] sm:$0xff]  ;;  %v288_v38 = vadd.f32 %v1705_v60, %v265_v36  ;;  %v303_v39 = vmax.f32 %v287_v34, 0.0  ;;  %v270_v48 = vld [vmem:[#allocation2 + $0x60] sm:$0xff]  ;;  %v295_v2 = vadd.f32 %v1705_v60, %v272_v63  ;;  %p1391_p0 = scmp.ne.s32.totalorder %s1013_s7, %s1390_s29  ;;  %p1395_p1 = scmp.lt.s32.totalorder %s1013_s7, %s1013_s7 }
  0xef   :  { %v286_v40 = vadd.f32 %v1705_v60, %v263_v37  ;;  %v301_v41 = vmax.f32 %v285_v35, 0.0  ;;  %v293_v56 = vadd.f32 %v1705_v60, %v270_v48  ;;  %v273_v0 = vld [vmem:[#allocation2 + $0x78] sm:$0xff]  ;;  %p1396_p2 = scmp.lt.s32.totalorder %s1394_s30, %s1390_s29 }
  0xf0   :  { %v304_v47 = vmax.f32 %v288_v38, 0.0  ;;  %v271_v49 = vld [vmem:[#allocation2 + $0x68] sm:$0xff]  ;;  %v296_v3 = vadd.f32 %v1705_v60, %v273_v0  ;;  %v311_v5 = vmax.f32 %v295_v2, 0.0 }
  0xf1   :  { %v302_v50 = vmax.f32 %v286_v40, 0.0  ;;  %v294_v57 = vadd.f32 %v1705_v60, %v271_v49  ;;  %v309_v61 = vmax.f32 %v293_v56, 0.0  ;;  %p1397_p3 = por %p1396_p2, %p1395_p1 }
  0xf2   :  { %v321_v51 = vpack.c.bf16 %v304_v47, %v303_v39  ;;  %v312_v6 = vmax.f32 %v296_v3, 0.0 }
  0xf3   :  { %v320_v54 = vpack.c.bf16 %v302_v50, %v301_v41  ;;  %v310_v62 = vmax.f32 %v294_v57, 0.0  ;;  %p1398_p4 = pnand %p1397_p3, %p1391_p0 }
  0xf4   :  { %v325_v7 = vpack.c.bf16 %v312_v6, %v311_v5 }
  0xf5   :  { %1204 = vmatprep.mubr.msk.bf16.mxu1 %vm35_vm2, %v320_v54  ;;  %v324_v4 = vpack.c.bf16 %v310_v62, %v309_v61 }
  0xf6   :  { %1205 = vmatmul.mubr.msk.bf16.gmra.mrb[12].mxu1 %vm35_vm2, %v321_v51 }
  0xf7   :  { %1208 = vmatprep.mubr.msk.bf16.mxu1 %vm35_vm2, %v322_v55 }
  0xfe   :  { %1209 = vmatmul.mubr.msk.bf16.gmra.mrb[16].mxu1 %vm35_vm2, %v323_v1 }
  0xff   :  { %1212 = vmatprep.mubr.msk.bf16.mxu1 %vm35_vm2, %v324_v4 }
 0x106   :  { %1213 = vmatmul.mubr.msk.bf16.gmra.mrb[20].mxu1 %vm35_vm2, %v325_v7 }
 0x107   :  { %1309 = vmatprep.mubr.msk.f32.mxu1 %vm1417_vm7, %v1416_v44 }
 0x161   :  { %v1220_v8 = vpop.f32.mrb[8].mxu0 }
 0x162   :  { %v715_v9 = vpop.f32.mrb[9].mxu0 }
 0x165   :  { %v1223_v10 = vpop.f32.mrb[10].mxu0 }
 0x166   :  { %v725_v11 = vpop.f32.mrb[11].mxu0 }
 0x169   :  { %v1226_v12 = vpop.f32.mrb[12].mxu0 }
 0x16a   :  { %v735_v13 = vpop.f32.mrb[13].mxu0 }
 0x16d   :  { %v1229_v14 = vpop.f32.mrb[14].mxu0 }
 0x16e   :  { %v745_v15 = vpop.f32.mrb[15].mxu0 }
 0x171   :  { %v1739_v16 = vpop.f32.mrb[16].mxu0 }
 0x172   :  { %v1741_v60 = vpop.f32.mrb[17].mxu0 }
 0x175   :  { %v1743_v17 = vpop.f32.mrb[18].mxu0 }
 0x176   :  { %v765_v18 = vpop.f32.mrb[19].mxu0 }
 0x179   :  { %v1745_v19 = vpop.f32.mrb[20].mxu0 }
 0x17a   :  { %v1747_v20 = vpop.f32.mrb[21].mxu0 }
 0x17d   :  { %v1749_v21 = vpop.f32.mrb[22].mxu0 }
 0x17e   :  { %v1751_v22 = vpop.f32.mrb[23].mxu0 }
 0x1c1   :  { %v1202_v25 = vpop.f32.mrb[8].mxu1 }
 0x1c2   :  { %v411_v26 = vadd.f32 %v1202_v25, %v1762_v24  ;;  %v402_v27 = vpop.f32.mrb[9].mxu1 }
 0x1c3   :  { %v403_v28 = vadd.f32 %v1762_v24, %v402_v27  ;;  %v1203_v29 = vpop.f32.mrb[10].mxu1 }
 0x1c4   :  { %v467_v30 = vmax.f32 %v411_v26, 0.0  ;;  %v414_v31 = vadd.f32 %v1203_v29, %v1762_v24  ;;  %v405_v32 = vpop.f32.mrb[11].mxu1 }
 0x1c5   :  { %v465_v34 = vmax.f32 %v403_v28, 0.0  ;;  %v406_v44 = vadd.f32 %v1762_v24, %v405_v32 }
 0x1c6   :  { %v796_v35 = vmul.f32 %v725_v11, %v467_v30  ;;  %v468_v36 = vmax.f32 %v414_v31, 0.0 }
 0x1c7   :  { %v794_v37 = vmul.f32 %v715_v9, %v465_v34  ;;  %v466_v38 = vmax.f32 %v406_v44, 0.0 }
 0x1c8   :  { %v797_v39 = vmul.f32 %v1223_v10, %v468_v36 }
 0x1c9   :  { %v795_v40 = vmul.f32 %v1220_v8, %v466_v38  ;;  %v1206_v41 = vpop.f32.mrb[12].mxu1 }
 0x1ca   :  { %v1349_v42 = vpack.c.bf16 %v797_v39, %v796_v35  ;;  %v427_v43 = vadd.f32 %v1206_v41, %v1762_v24  ;;  %v418_v45 = vpop.f32.mrb[13].mxu1 }
 0x1cb   :  { %v1345_v47 = vpack.c.bf16 %v795_v40, %v794_v37  ;;  %v419_v48 = vadd.f32 %v1762_v24, %v418_v45  ;;  %v1207_v49 = vpop.f32.mrb[14].mxu1 }
 0x1cc   :  { %v471_v50 = vmax.f32 %v427_v43, 0.0  ;;  %v430_v51 = vadd.f32 %v1207_v49, %v1762_v24  ;;  %v421_v52 = vpop.f32.mrb[15].mxu1 }
 0x1cd   :  { %v469_v53 = vmax.f32 %v419_v48, 0.0  ;;  %v422_v54 = vadd.f32 %v1762_v24, %v421_v52  ;;  %1347 = vmatpush3.bf16.xpose.msk.msra.mxu1 %vm1771_vm3, %v1345_v47 }
 0x1ce   :  { %v800_v55 = vmul.f32 %v745_v15, %v471_v50  ;;  %v472_v56 = vmax.f32 %v430_v51, 0.0  ;;  %1348 = vmatprep.subr.bf16.mxu1 %v1415_v33 }
 0x1cf   :  { %v798_v57 = vmul.f32 %v735_v13, %v469_v53  ;;  %v470_v58 = vmax.f32 %v422_v54, 0.0 }
 0x1d0   :  { %v801_v59 = vmul.f32 %v1229_v14, %v472_v56 }
 0x1d1   :  { %v799_v61 = vmul.f32 %v1226_v12, %v470_v58  ;;  %v1210_v62 = vpop.f32.mrb[16].mxu1 }
 0x1d2   :  { %v1357_v63 = vpack.c.bf16 %v801_v59, %v800_v55  ;;  %v443_v0 = vadd.f32 %v1210_v62, %v1762_v24  ;;  %v434_v1 = vpop.f32.mrb[17].mxu1 }
 0x1d3   :  { %v1353_v2 = vpack.c.bf16 %v799_v61, %v798_v57  ;;  %v435_v3 = vadd.f32 %v1762_v24, %v434_v1  ;;  %v1211_v4 = vpop.f32.mrb[18].mxu1 }
 0x1d4   :  { %v475_v5 = vmax.f32 %v443_v0, 0.0  ;;  %v446_v6 = vadd.f32 %v1211_v4, %v1762_v24  ;;  %v437_v7 = vpop.f32.mrb[19].mxu1 }
 0x1d5   :  { %v473_v8 = vmax.f32 %v435_v3, 0.0  ;;  %v438_v9 = vadd.f32 %v1762_v24, %v437_v7  ;;  %1351 = vmatpush3.bf16.xpose.msk.msra.mxu1 %vm1771_vm3, %v1349_v42 }
 0x1d6   :  { %v804_v10 = vmul.f32 %v765_v18, %v475_v5  ;;  %v476_v11 = vmax.f32 %v446_v6, 0.0  ;;  %1352 = vmatprep.subr.bf16.mxu1 %v1415_v33 }
 0x1d7   :  { %v802_v12 = vmul.f32 %v1741_v60, %v473_v8  ;;  %v474_v13 = vmax.f32 %v438_v9, 0.0 }
 0x1d8   :  { %v805_v14 = vmul.f32 %v1743_v17, %v476_v11 }
 0x1d9   :  { %v803_v15 = vmul.f32 %v1739_v16, %v474_v13  ;;  %v1214_v23 = vpop.f32.mrb[20].mxu1 }
 0x1da   :  { %v1365_v25 = vpack.c.bf16 %v805_v14, %v804_v10  ;;  %v459_v26 = vadd.f32 %v1214_v23, %v1762_v24  ;;  %v450_v27 = vpop.f32.mrb[21].mxu1 }
 0x1db   :  { %v1361_v28 = vpack.c.bf16 %v803_v15, %v802_v12  ;;  %v451_v29 = vadd.f32 %v1762_v24, %v450_v27  ;;  %v1215_v30 = vpop.f32.mrb[22].mxu1 }
 0x1dc   :  { %v479_v18 = vmax.f32 %v459_v26, 0.0  ;;  %v462_v31 = vadd.f32 %v1215_v30, %v1762_v24  ;;  %v453_v32 = vpop.f32.mrb[23].mxu1 }
 0x1dd   :  { %v477_v34 = vmax.f32 %v451_v29, 0.0  ;;  %v454_v60 = vadd.f32 %v1762_v24, %v453_v32  ;;  %1355 = vmatpush3.bf16.xpose.msk.msra.mxu1 %vm1771_vm3, %v1353_v2 }
 0x1de   :  { %v808_v16 = vmul.f32 %v1751_v22, %v479_v18  ;;  %v480_v17 = vmax.f32 %v462_v31, 0.0  ;;  %1356 = vmatprep.subr.bf16.mxu1 %v1415_v33 }
 0x1df   :  { %v806_v44 = vmul.f32 %v1747_v20, %v477_v34  ;;  %v478_v35 = vmax.f32 %v454_v60, 0.0  ;;  %v880_v20 = vpop.f32.mrb[24].mxu0 }
 0x1e0   :  { %v809_v36 = vmul.f32 %v1749_v21, %v480_v17  ;;  %v1276_v21 = vpop.f32.mrb[25].mxu0 }
 0x1e1   :  { %v807_v37 = vmul.f32 %v1745_v19, %v478_v35  ;;  %v1418_v19 = vmov 1.0  }
 0x1e2   :  { %v1373_v38 = vpack.c.bf16 %v809_v36, %v808_v16 }
 0x1e3   :  { %v1369_v39 = vpack.c.bf16 %v807_v37, %v806_v44 }
 0x1e5   :  { %1359 = vmatpush3.bf16.xpose.msk.msra.mxu1 %vm1771_vm3, %v1357_v63 }
 0x1e6   :  { %1360 = vmatprep.subr.bf16.mxu1 %v1415_v33 }
 0x1ed   :  { %1363 = vmatpush3.bf16.xpose.msk.msra.mxu1 %vm1771_vm3, %v1361_v28 }
 0x1ee   :  { %1364 = vmatprep.subr.bf16.mxu1 %v1415_v33 }
 0x1f5   :  { %1367 = vmatpush3.bf16.xpose.msk.msra.mxu1 %vm1771_vm3, %v1365_v25 }
 0x1f6   :  { %1368 = vmatprep.subr.bf16.mxu1 %v1415_v33 }
 0x1fd   :  { %1371 = vmatpush3.bf16.xpose.msk.msra.mxu1 %vm1771_vm3, %v1369_v39 }
 0x1fe   :  { %1372 = vmatprep.subr.bf16.mxu1 %v1415_v33 }
 0x205   :  { %1375 = vmatpush3.bf16.xpose.msk.msra.mxu1 %vm1771_vm3, %v1373_v38 }
 0x20c   :  { %1310 = vmatmul.mubr.msk.f32.vlgmr.msra.gmra.mrb[24].mxu1 %vm35_vm2, %v1418_v19 }
 0x2df   :  { %v1001_v22 = vpop.f32.mrb[24].mxu1 }
 0x2e0   :  { %v1002_v24 = vadd.f32 %v1001_v22, %v880_v20  ;;  %v1311_v40 = vpop.f32.mrb[25].mxu1 }
 0x2e2   :  { %1005 = vst [vmem:[#allocation3] sm:$0x1] %v1002_v24 }
 0x2e3   :  { %1401 = shalt.err (!%p1398_p4)
}
 0x2e4   :  { %s1402_s11 = scalar_lea.hbm %s1837_s8, 16 }
 0x2e5   :  { %p1403_p5 = scmp.ne.s32.totalorder %s1837_s8, %s1402_s11  ;;  %p1406_p6 = scmp.lt.u32.totalorder %s1402_s11, %s1837_s8 }
 0x2e7   :  { %p1408_p7 = pnand %p1406_p6, %p1403_p5 }
 0x2e9   :  { %1411 = shalt.err (!%p1408_p7)
}
 0x2ea   :  { %1015 = dma.vmem_to_hbm [thread:$0]  %s1013_s7, 16, %s1837_s8, [#allocation4]  }
 0x2eb   :  { %1412 = dma.done.wait [#allocation4], 16  }
 0x2ec   :  { %1413 = vsyncadd [#allocation4], 4294967280 }
 0x2ed   :  { %1019 = vsyncpa [#allocation4], 1 }

</bundles_post_ra>
